<compile_context>
chip_gen: v5e
topology: v5e:2x2
jax: 0.10.0
libtpu: 0.0.40
codegen_flags: <defaults>
</compile_context>

<pallas_src>
import jax
import jax.numpy as jnp
from jax.experimental import pallas as pl
from jax.experimental.pallas import tpu as pltpu

N_NODES = 32     # nodes per graph
IN_FEATS = 8     # embedding.input_dim
EMB_DIM = 32     # node embedding dim d
TOP_K = 15
N_HIDDEN = 16
EPS = 1e-8       # nn.CosineSimilarity default eps


# ----------------------------------------------------------------------------
# Fused kernel: GCN embed (x2) -> cosine sim -> bottom-k -> MLP head
# ----------------------------------------------------------------------------
def _sgnn_fused_kernel(a1_ref, x1_ref, a2_ref, x2_ref,
                       w_emb_ref, b_emb_ref,
                       w1_ref, b1_ref, w2_ref, b2_ref,
                       out_ref, h1_ref, h2_ref):
    w_emb = w_emb_ref[...]
    b_emb = b_emb_ref[...]

    # --- GCN embedding, reordered as A @ (X @ W): lane-dense intermediates ---
    xw1 = jnp.dot(x1_ref[...], w_emb, preferred_element_type=jnp.float32)
    h1 = jnp.maximum(
        jnp.dot(a1_ref[...], xw1, preferred_element_type=jnp.float32) + b_emb, 0.0)
    xw2 = jnp.dot(x2_ref[...], w_emb, preferred_element_type=jnp.float32)
    h2 = jnp.maximum(
        jnp.dot(a2_ref[...], xw2, preferred_element_type=jnp.float32) + b_emb, 0.0)
    h1_ref[...] = h1
    h2_ref[...] = h2

    # --- per-node cosine similarity (VMEM-resident, never hits HBM) ---
    # sim_i = <h1_i, h2_i> * rsqrt(max(||h1_i||^2 * ||h2_i||^2, eps^2))
    dot = jnp.sum(h1 * h2, axis=-1, keepdims=True)       # (N, 1)
    n1sq = jnp.sum(h1 * h1, axis=-1, keepdims=True)
    n2sq = jnp.sum(h2 * h2, axis=-1, keepdims=True)
    sim = dot * jax.lax.rsqrt(jnp.maximum(n1sq * n2sq, EPS * EPS))   # (N, 1)

    # --- relayout sim column -> row via masked sublane reduce (no reshape) ---
    row_i = jax.lax.broadcasted_iota(jnp.int32, (N_NODES, N_NODES), 0)
    col_j = jax.lax.broadcasted_iota(jnp.int32, (N_NODES, N_NODES), 1)
    sim_row = jnp.sum(jnp.where(row_i == col_j, sim, 0.0),
                      axis=0, keepdims=True)              # (1, N)

    # --- branch-free bottom-k: rank each node (ties broken by node index) ---
    # ranks is a permutation of 0..N-1; node i holds the ranks[i]-th smallest sim.
    lt = (sim_row < sim).astype(jnp.int32)                # [i,j] = sim[j] < sim[i]
    eq_before = jnp.logical_and(sim_row == sim, col_j < row_i).astype(jnp.int32)
    ranks = jnp.sum(lt + eq_before, axis=-1, keepdims=True)   # (N, 1) int32

    # --- Linear #1 fused with the selection ---
    #   h = b1 + sum_k v_k * W1[k, :]   (v = k smallest sims, ascending)
    #     = b1 + sum_i sim[i] * W1[ranks[i], :]   (ranks >= K contribute 0)
    k_iota = jax.lax.broadcasted_iota(jnp.int32, (N_NODES, TOP_K), 1)
    onehot = (ranks == k_iota).astype(jnp.float32)        # (N, K)
    w1_sel = jnp.dot(onehot, w1_ref[...],
                     preferred_element_type=jnp.float32)  # (N, H) = W1[ranks] / 0
    h_pre = b1_ref[...] + jnp.sum(sim * w1_sel, axis=0, keepdims=True)   # (1, H)

    h_relu = jnp.maximum(h_pre, 0.0)   # dropout(p=0.1) in eval mode = identity

    # --- Linear #2 on the VPU: w2 stored as (1, N_HIDDEN) (PyTorch
    # Linear(out=1, in=H).weight layout) -> mul + lane reduce. ---
    y = jnp.sum(h_relu * w2_ref[...], axis=-1, keepdims=True)   # (1, 1)
    out_ref[...] = y + b2_ref[...]


def sgnn_forward(a1, x1, a2, x2, params):
    n, d = N_NODES, EMB_DIM

    def full_spec(shape):
        return pl.BlockSpec(shape, lambda i: (0, 0))

    out, h1, h2 = pl.pallas_call(
        _sgnn_fused_kernel,
        grid=(1,),
        in_specs=[
            full_spec(a1.shape), full_spec(x1.shape),
            full_spec(a2.shape), full_spec(x2.shape),
            full_spec(params["w_emb"].shape), full_spec(params["b_emb"].shape),
            full_spec(params["w1"].shape), full_spec(params["b1"].shape),
            full_spec(params["w2"].shape), full_spec(params["b2"].shape),
        ],
        out_specs=[
            pl.BlockSpec((1, 1), lambda i: (0, 0)),
            pl.BlockSpec((n, d), lambda i: (0, 0)),
            pl.BlockSpec((n, d), lambda i: (0, 0)),
        ],
        out_shape=[
            jax.ShapeDtypeStruct((1, 1), jnp.float32),
            jax.ShapeDtypeStruct((n, d), jnp.float32),
            jax.ShapeDtypeStruct((n, d), jnp.float32),
        ],
        compiler_params=pltpu.CompilerParams(
            dimension_semantics=("arbitrary",)),
    )(a1, x1, a2, x2,
      params["w_emb"], params["b_emb"],
      params["w1"], params["b1"], params["w2"], params["b2"])
    return out, h1, h2


def _sym_normalize(a):
    """D^{-1/2} (A + I) D^{-1/2} — standard GCN normalization (host-side glue)."""
    a = a + jnp.eye(a.shape[0], dtype=a.dtype)
    deg = jnp.sum(a, axis=1)
    dinv = 1.0 / jnp.sqrt(deg)
    return a * dinv[:, None] * dinv[None, :]


if __name__ == "__main__":
    key = jax.random.PRNGKey(0)
    k = jax.random.split(key, 8)

    # Two small synthetic graphs: dense symmetric adjacency + node features.
    # TODO(synk): dgl graph construction / batching and topk_nodes' node-index
    # bookkeeping have no Pallas equivalent; only the value path (which feeds
    # the MLP) is implemented, with the k-selection done inside the kernel.
    x1 = jax.random.normal(k[0], (N_NODES, IN_FEATS), jnp.float32)
    x2 = jax.random.normal(k[1], (N_NODES, IN_FEATS), jnp.float32)
    a1 = (jax.random.uniform(k[2], (N_NODES, N_NODES)) < 0.2).astype(jnp.float32)
    a2 = (jax.random.uniform(k[3], (N_NODES, N_NODES)) < 0.2).astype(jnp.float32)
    a1 = _sym_normalize(jnp.maximum(a1, a1.T))
    a2 = _sym_normalize(jnp.maximum(a2, a2.T))

    # Deterministic synthetic parameters (no checkpoint loading).
    params = {
        "w_emb": jax.random.normal(k[4], (IN_FEATS, EMB_DIM), jnp.float32)
                 * (1.0 / jnp.sqrt(IN_FEATS)),
        "b_emb": jnp.zeros((1, EMB_DIM), jnp.float32),
        "w1": jax.random.normal(k[5], (TOP_K, N_HIDDEN), jnp.float32)
              * (1.0 / jnp.sqrt(TOP_K)),
        "b1": jnp.zeros((1, N_HIDDEN), jnp.float32),
        # Linear(H -> 1) weight kept in (1, H) layout so Linear #2 is a pure
        # VPU mul + lane reduce in the kernel.
        "w2": jax.random.normal(k[6], (1, N_HIDDEN), jnp.float32)
              * (1.0 / jnp.sqrt(N_HIDDEN)),
        "b2": jnp.zeros((1, 1), jnp.float32),
    }

    out, h1, h2 = sgnn_forward(a1, x1, a2, x2, params)
    jax.block_until_ready((out, h1, h2))
    assert out.shape == (1, 1)
    assert h1.shape == (N_NODES, EMB_DIM) and h2.shape == (N_NODES, EMB_DIM)
    print("KERNEL_OK")
</pallas_src>

<mosaic_0001>
module attributes {stable_mosaic.version = 11 : i64} {
  func.func @_sgnn_fused_kernel(%arg0: i32, %arg1: memref<32x32xf32, #tpu.memory_space<vmem>>, %arg2: memref<32x8xf32, #tpu.memory_space<vmem>>, %arg3: memref<32x32xf32, #tpu.memory_space<vmem>>, %arg4: memref<32x8xf32, #tpu.memory_space<vmem>>, %arg5: memref<8x32xf32, #tpu.memory_space<vmem>>, %arg6: memref<1x32xf32, #tpu.memory_space<vmem>>, %arg7: memref<15x16xf32, #tpu.memory_space<vmem>>, %arg8: memref<1x16xf32, #tpu.memory_space<vmem>>, %arg9: memref<1x16xf32, #tpu.memory_space<vmem>>, %arg10: memref<1x1xf32, #tpu.memory_space<vmem>>, %arg11: memref<1x1xf32, #tpu.memory_space<vmem>>, %arg12: memref<32x32xf32, #tpu.memory_space<vmem>>, %arg13: memref<32x32xf32, #tpu.memory_space<vmem>>) attributes {dimension_semantics = [#tpu.dimension_semantics<arbitrary>], iteration_bounds = array<i64: 1>, scalar_prefetch = 0 : i64, scratch_operands = 0 : i64, tpu.core_type = #tpu.core_type<tc>, window_params = [{pipeline_mode = #tpu.pipeline_mode<synchronous>, transform_indices = @transform_0, window_bounds = array<i64: 32, 32>}, {pipeline_mode = #tpu.pipeline_mode<synchronous>, transform_indices = @transform_1, window_bounds = array<i64: 32, 8>}, {pipeline_mode = #tpu.pipeline_mode<synchronous>, transform_indices = @transform_2, window_bounds = array<i64: 32, 32>}, {pipeline_mode = #tpu.pipeline_mode<synchronous>, transform_indices = @transform_3, window_bounds = array<i64: 32, 8>}, {pipeline_mode = #tpu.pipeline_mode<synchronous>, transform_indices = @transform_4, window_bounds = array<i64: 8, 32>}, {pipeline_mode = #tpu.pipeline_mode<synchronous>, transform_indices = @transform_5, window_bounds = array<i64: 1, 32>}, {pipeline_mode = #tpu.pipeline_mode<synchronous>, transform_indices = @transform_6, window_bounds = array<i64: 15, 16>}, {pipeline_mode = #tpu.pipeline_mode<synchronous>, transform_indices = @transform_7, window_bounds = array<i64: 1, 16>}, {pipeline_mode = #tpu.pipeline_mode<synchronous>, transform_indices = @transform_8, window_bounds = array<i64: 1, 16>}, {pipeline_mode = #tpu.pipeline_mode<synchronous>, transform_indices = @transform_9, window_bounds = array<i64: 1, 1>}, {pipeline_mode = #tpu.pipeline_mode<synchronous>, transform_indices = @transform_10, window_bounds = array<i64: 1, 1>}, {pipeline_mode = #tpu.pipeline_mode<synchronous>, transform_indices = @transform_11, window_bounds = array<i64: 32, 32>}, {pipeline_mode = #tpu.pipeline_mode<synchronous>, transform_indices = @transform_12, window_bounds = array<i64: 32, 32>}]} {
    %c0 = arith.constant 0 : index
    %c0_0 = arith.constant 0 : index
    %0 = vector.load %arg5[%c0, %c0_0] : memref<8x32xf32, #tpu.memory_space<vmem>>, vector<8x32xf32>
    %c0_1 = arith.constant 0 : index
    %c0_2 = arith.constant 0 : index
    %1 = vector.load %arg6[%c0_1, %c0_2] : memref<1x32xf32, #tpu.memory_space<vmem>>, vector<1x32xf32>
    %c0_3 = arith.constant 0 : index
    %c0_4 = arith.constant 0 : index
    %2 = vector.load %arg2[%c0_3, %c0_4] : memref<32x8xf32, #tpu.memory_space<vmem>>, vector<32x8xf32>
    %cst = arith.constant dense<0.000000e+00> : vector<32x32xf32>
    %3 = tpu.matmul %2, %0, %cst {dimension_numbers = #tpu.dot_dimension_numbers<[1], [0], [0], [1], [0, 0, 1, 1], [], []>} : vector<32x8xf32>, vector<8x32xf32>, vector<32x32xf32> -> vector<32x32xf32>
    %c0_5 = arith.constant 0 : index
    %c0_6 = arith.constant 0 : index
    %4 = vector.load %arg1[%c0_5, %c0_6] : memref<32x32xf32, #tpu.memory_space<vmem>>, vector<32x32xf32>
    %cst_7 = arith.constant dense<0.000000e+00> : vector<32x32xf32>
    %5 = tpu.matmul %4, %3, %cst_7 {dimension_numbers = #tpu.dot_dimension_numbers<[1], [0], [0], [1], [0, 0, 1, 1], [], []>} : vector<32x32xf32>, vector<32x32xf32>, vector<32x32xf32> -> vector<32x32xf32>
    %6 = vector.broadcast %1 : vector<1x32xf32> to vector<32x32xf32>
    %7 = arith.addf %5, %6 : vector<32x32xf32>
    %cst_8 = arith.constant 0.000000e+00 : f32
    %8 = vector.broadcast %cst_8 : f32 to vector<32x32xf32>
    %9 = arith.maximumf %7, %8 : vector<32x32xf32>
    %c0_9 = arith.constant 0 : index
    %c0_10 = arith.constant 0 : index
    %10 = vector.load %arg4[%c0_9, %c0_10] : memref<32x8xf32, #tpu.memory_space<vmem>>, vector<32x8xf32>
    %cst_11 = arith.constant dense<0.000000e+00> : vector<32x32xf32>
    %11 = tpu.matmul %10, %0, %cst_11 {dimension_numbers = #tpu.dot_dimension_numbers<[1], [0], [0], [1], [0, 0, 1, 1], [], []>} : vector<32x8xf32>, vector<8x32xf32>, vector<32x32xf32> -> vector<32x32xf32>
    %c0_12 = arith.constant 0 : index
    %c0_13 = arith.constant 0 : index
    %12 = vector.load %arg3[%c0_12, %c0_13] : memref<32x32xf32, #tpu.memory_space<vmem>>, vector<32x32xf32>
    %cst_14 = arith.constant dense<0.000000e+00> : vector<32x32xf32>
    %13 = tpu.matmul %12, %11, %cst_14 {dimension_numbers = #tpu.dot_dimension_numbers<[1], [0], [0], [1], [0, 0, 1, 1], [], []>} : vector<32x32xf32>, vector<32x32xf32>, vector<32x32xf32> -> vector<32x32xf32>
    %14 = vector.broadcast %1 : vector<1x32xf32> to vector<32x32xf32>
    %15 = arith.addf %13, %14 : vector<32x32xf32>
    %cst_15 = arith.constant 0.000000e+00 : f32
    %16 = vector.broadcast %cst_15 : f32 to vector<32x32xf32>
    %17 = arith.maximumf %15, %16 : vector<32x32xf32>
    %c0_16 = arith.constant 0 : index
    %c0_17 = arith.constant 0 : index
    %18 = vector.load %arg12[%c0_16, %c0_17] : memref<32x32xf32, #tpu.memory_space<vmem>>, vector<32x32xf32>
    tpu.vector_store %arg12[%c0_16, %c0_17], %9 {strides = array<i32>} : memref<32x32xf32, #tpu.memory_space<vmem>>, vector<32x32xf32>,
    %c0_18 = arith.constant 0 : index
    %c0_19 = arith.constant 0 : index
    %19 = vector.load %arg13[%c0_18, %c0_19] : memref<32x32xf32, #tpu.memory_space<vmem>>, vector<32x32xf32>
    tpu.vector_store %arg13[%c0_18, %c0_19], %17 {strides = array<i32>} : memref<32x32xf32, #tpu.memory_space<vmem>>, vector<32x32xf32>,
    %20 = arith.mulf %9, %17 : vector<32x32xf32>
    %cst_20 = arith.constant dense<0.000000e+00> : vector<32xf32>
    %21 = vector.multi_reduction <add>, %20, %cst_20 [1] : vector<32x32xf32> to vector<32xf32>
    %22 = vector.shape_cast %21 : vector<32xf32> to vector<32x1xf32>
    %23 = arith.mulf %9, %9 : vector<32x32xf32>
    %cst_21 = arith.constant dense<0.000000e+00> : vector<32xf32>
    %24 = vector.multi_reduction <add>, %23, %cst_21 [1] : vector<32x32xf32> to vector<32xf32>
    %25 = vector.shape_cast %24 : vector<32xf32> to vector<32x1xf32>
    %26 = arith.mulf %17, %17 : vector<32x32xf32>
    %cst_22 = arith.constant dense<0.000000e+00> : vector<32xf32>
    %27 = vector.multi_reduction <add>, %26, %cst_22 [1] : vector<32x32xf32> to vector<32xf32>
    %28 = vector.shape_cast %27 : vector<32xf32> to vector<32x1xf32>
    %29 = arith.mulf %25, %28 : vector<32x1xf32>
    %cst_23 = arith.constant 1.000000e-16 : f32
    %30 = vector.broadcast %cst_23 : f32 to vector<32x1xf32>
    %31 = arith.maximumf %29, %30 : vector<32x1xf32>
    %32 = math.rsqrt %31 : vector<32x1xf32>
    %33 = arith.mulf %22, %32 : vector<32x1xf32>
    %34 = tpu.iota {dimensions = array<i32: 0>} : vector<32x32xi32>
    %35 = tpu.iota {dimensions = array<i32: 1>} : vector<32x32xi32>
    %36 = arith.cmpi eq, %34, %35 : vector<32x32xi32>
    %cst_24 = arith.constant 0.000000e+00 : f32
    %37 = vector.shape_cast %33 : vector<32x1xf32> to vector<32x1xf32>
    %38 = vector.broadcast %37 : vector<32x1xf32> to vector<32x32xf32>
    %39 = vector.broadcast %cst_24 : f32 to vector<32x32xf32>
    %40 = arith.select %36, %38, %39 : vector<32x32xi1>, vector<32x32xf32>
    %cst_25 = arith.constant dense<0.000000e+00> : vector<32xf32>
    %41 = vector.multi_reduction <add>, %40, %cst_25 [0] : vector<32x32xf32> to vector<32xf32>
    %42 = vector.shape_cast %41 : vector<32xf32> to vector<1x32xf32>
    %43 = vector.broadcast %42 : vector<1x32xf32> to vector<32x32xf32>
    %44 = vector.broadcast %33 : vector<32x1xf32> to vector<32x32xf32>
    %45 = arith.cmpf olt, %43, %44 : vector<32x32xf32>
    %46 = arith.extui %45 : vector<32x32xi1> to vector<32x32xi32>
    %47 = vector.broadcast %42 : vector<1x32xf32> to vector<32x32xf32>
    %48 = vector.broadcast %33 : vector<32x1xf32> to vector<32x32xf32>
    %49 = arith.cmpf oeq, %47, %48 : vector<32x32xf32>
    %50 = arith.cmpi slt, %35, %34 : vector<32x32xi32>
    %51 = arith.andi %49, %50 : vector<32x32xi1>
    %52 = arith.extui %51 : vector<32x32xi1> to vector<32x32xi32>
    %53 = arith.addi %46, %52 : vector<32x32xi32>
    %cst_26 = arith.constant dense<0> : vector<32xi32>
    %54 = vector.multi_reduction <add>, %53, %cst_26 [1] : vector<32x32xi32> to vector<32xi32>
    %55 = vector.shape_cast %54 : vector<32xi32> to vector<32x1xi32>
    %56 = tpu.iota {dimensions = array<i32: 1>} : vector<32x15xi32>
    %57 = vector.broadcast %55 : vector<32x1xi32> to vector<32x15xi32>
    %58 = arith.cmpi eq, %57, %56 : vector<32x15xi32>
    %59 = arith.extui %58 : vector<32x15xi1> to vector<32x15xi32>
    %60 = arith.sitofp %59 : vector<32x15xi32> to vector<32x15xf32>
    %c0_27 = arith.constant 0 : index
    %c0_28 = arith.constant 0 : index
    %61 = vector.load %arg7[%c0_27, %c0_28] : memref<15x16xf32, #tpu.memory_space<vmem>>, vector<15x16xf32>
    %cst_29 = arith.constant dense<0.000000e+00> : vector<32x16xf32>
    %62 = tpu.matmul %60, %61, %cst_29 {dimension_numbers = #tpu.dot_dimension_numbers<[1], [0], [0], [1], [0, 0, 1, 1], [], []>} : vector<32x15xf32>, vector<15x16xf32>, vector<32x16xf32> -> vector<32x16xf32>
    %c0_30 = arith.constant 0 : index
    %c0_31 = arith.constant 0 : index
    %63 = vector.load %arg8[%c0_30, %c0_31] : memref<1x16xf32, #tpu.memory_space<vmem>>, vector<1x16xf32>
    %64 = vector.broadcast %33 : vector<32x1xf32> to vector<32x16xf32>
    %65 = arith.mulf %64, %62 : vector<32x16xf32>
    %cst_32 = arith.constant dense<0.000000e+00> : vector<16xf32>
    %66 = vector.multi_reduction <add>, %65, %cst_32 [0] : vector<32x16xf32> to vector<16xf32>
    %67 = vector.shape_cast %66 : vector<16xf32> to vector<1x16xf32>
    %68 = arith.addf %63, %67 : vector<1x16xf32>
    %cst_33 = arith.constant 0.000000e+00 : f32
    %69 = vector.broadcast %cst_33 : f32 to vector<1x16xf32>
    %70 = arith.maximumf %68, %69 : vector<1x16xf32>
    %c0_34 = arith.constant 0 : index
    %c0_35 = arith.constant 0 : index
    %71 = vector.load %arg9[%c0_34, %c0_35] : memref<1x16xf32, #tpu.memory_space<vmem>>, vector<1x16xf32>
    %72 = arith.mulf %70, %71 : vector<1x16xf32>
    %cst_36 = arith.constant dense<0.000000e+00> : vector<1xf32>
    %73 = vector.multi_reduction <add>, %72, %cst_36 [1] : vector<1x16xf32> to vector<1xf32>
    %74 = vector.shape_cast %73 : vector<1xf32> to vector<1x1xf32>
    %c0_37 = arith.constant 0 : index
    %c0_38 = arith.constant 0 : index
    %75 = vector.load %arg10[%c0_37, %c0_38] : memref<1x1xf32, #tpu.memory_space<vmem>>, vector<1x1xf32>
    %76 = arith.addf %74, %75 : vector<1x1xf32>
    %c0_39 = arith.constant 0 : index
    %c0_40 = arith.constant 0 : index
    %77 = vector.load %arg11[%c0_39, %c0_40] : memref<1x1xf32, #tpu.memory_space<vmem>>, vector<1x1xf32>
    tpu.vector_store %arg11[%c0_39, %c0_40], %76 {strides = array<i32>} : memref<1x1xf32, #tpu.memory_space<vmem>>, vector<1x1xf32>,
    return
  }
  func.func @transform_0(%arg0: i32) -> (i32, i32) {
    %c0_i32 = arith.constant 0 : i32
    %c0_i32_0 = arith.constant 0 : i32
    %c0_i32_1 = arith.constant 0 : i32
    return %c0_i32, %c0_i32_0 : i32, i32
  }
  func.func @transform_1(%arg0: i32) -> (i32, i32) {
    %c0_i32 = arith.constant 0 : i32
    %c0_i32_0 = arith.constant 0 : i32
    %c0_i32_1 = arith.constant 0 : i32
    return %c0_i32, %c0_i32_0 : i32, i32
  }
  func.func @transform_2(%arg0: i32) -> (i32, i32) {
    %c0_i32 = arith.constant 0 : i32
    %c0_i32_0 = arith.constant 0 : i32
    %c0_i32_1 = arith.constant 0 : i32
    return %c0_i32, %c0_i32_0 : i32, i32
  }
  func.func @transform_3(%arg0: i32) -> (i32, i32) {
    %c0_i32 = arith.constant 0 : i32
    %c0_i32_0 = arith.constant 0 : i32
    %c0_i32_1 = arith.constant 0 : i32
    return %c0_i32, %c0_i32_0 : i32, i32
  }
  func.func @transform_4(%arg0: i32) -> (i32, i32) {
    %c0_i32 = arith.constant 0 : i32
    %c0_i32_0 = arith.constant 0 : i32
    %c0_i32_1 = arith.constant 0 : i32
    return %c0_i32, %c0_i32_0 : i32, i32
  }
  func.func @transform_5(%arg0: i32) -> (i32, i32) {
    %c0_i32 = arith.constant 0 : i32
    %c0_i32_0 = arith.constant 0 : i32
    %c0_i32_1 = arith.constant 0 : i32
    return %c0_i32, %c0_i32_0 : i32, i32
  }
  func.func @transform_6(%arg0: i32) -> (i32, i32) {
    %c0_i32 = arith.constant 0 : i32
    %c0_i32_0 = arith.constant 0 : i32
    %c0_i32_1 = arith.constant 0 : i32
    return %c0_i32, %c0_i32_0 : i32, i32
  }
  func.func @transform_7(%arg0: i32) -> (i32, i32) {
    %c0_i32 = arith.constant 0 : i32
    %c0_i32_0 = arith.constant 0 : i32
    %c0_i32_1 = arith.constant 0 : i32
    return %c0_i32, %c0_i32_0 : i32, i32
  }
  func.func @transform_8(%arg0: i32) -> (i32, i32) {
    %c0_i32 = arith.constant 0 : i32
    %c0_i32_0 = arith.constant 0 : i32
    %c0_i32_1 = arith.constant 0 : i32
    return %c0_i32, %c0_i32_0 : i32, i32
  }
  func.func @transform_9(%arg0: i32) -> (i32, i32) {
    %c0_i32 = arith.constant 0 : i32
    %c0_i32_0 = arith.constant 0 : i32
    %c0_i32_1 = arith.constant 0 : i32
    return %c0_i32, %c0_i32_0 : i32, i32
  }
  func.func @transform_10(%arg0: i32) -> (i32, i32) {
    %c0_i32 = arith.constant 0 : i32
    %c0_i32_0 = arith.constant 0 : i32
    %c0_i32_1 = arith.constant 0 : i32
    return %c0_i32, %c0_i32_0 : i32, i32
  }
  func.func @transform_11(%arg0: i32) -> (i32, i32) {
    %c0_i32 = arith.constant 0 : i32
    %c0_i32_0 = arith.constant 0 : i32
    %c0_i32_1 = arith.constant 0 : i32
    return %c0_i32, %c0_i32_0 : i32, i32
  }
  func.func @transform_12(%arg0: i32) -> (i32, i32) {
    %c0_i32 = arith.constant 0 : i32
    %c0_i32_0 = arith.constant 0 : i32
    %c0_i32_1 = arith.constant 0 : i32
    return %c0_i32, %c0_i32_0 : i32, i32
  }
}

</mosaic_0001>

<bundles_post_ra>
// kernel: tpu_custom_call.1
= control target key start
LH: loop header
LB: loop body
LE: loop exit
PB: predicated region body
PF: predicated region fallthrough
CT: control target
= control target key end

     0   :  { %s1021_s0 = inlined_call_operand.vmem [shape: f32[32,32], index: 0, kind: input, shape index: {}]   ;;  %s1022_s1 = inlined_call_operand.vmem [shape: f32[32,8], index: 1, kind: input, shape index: {}]   ;;  %s1023_s2 = inlined_call_operand.vmem [shape: f32[32,32], index: 2, kind: input, shape index: {}]   ;;  %s1024_s3 = inlined_call_operand.vmem [shape: f32[32,8], index: 3, kind: input, shape index: {}]   ;;  %s1025_s4 = inlined_call_operand.vmem [shape: f32[8,32], index: 4, kind: input, shape index: {}]   ;;  %s1026_s5 = inlined_call_operand.vmem [shape: f32[1,32], index: 5, kind: input, shape index: {}]   ;;  %s1027_s6 = inlined_call_operand.hbm [shape: f32[15,16], index: 6, kind: input, shape index: {}]   ;;  %s1028_s7 = inlined_call_operand.vmem [shape: f32[1,16], index: 7, kind: input, shape index: {}]   ;;  %s1029_s8 = inlined_call_operand.vmem [shape: f32[1,16], index: 8, kind: input, shape index: {}]   ;;  %s1030_s9 = inlined_call_operand.<no memory space> [shape: f32[1,1], index: 9, kind: input, shape index: {}]   ;;  %s1031_s10 = inlined_call_operand.hbm [shape: f32[1,1], index: 10, kind: output, shape index: {0}]   ;;  %s1032_s11 = inlined_call_operand.hbm [shape: f32[32,32], index: 11, kind: output, shape index: {1}]   ;;  %s1033_s12 = inlined_call_operand.hbm [shape: f32[32,32], index: 12, kind: output, shape index: {2}]  }
   0x1   :  { %v18_v0 = vstv %s1030_s9 }
   0x2   :  { %19 = vst [vmem:[#allocation2] sm:$0x1] %v18_v0 }
   0x3   :  { %20 = vsyncpa [#allocation4], 0 }
   0x4   :  { %21 = vsyncpa [#allocation5], 0 }
   0x5   :  { %22 = vsyncpa [#allocation8], 0  ;;  %s39_s25 = sshll.u32 %s1027_s6, 4  ;;  %s759_s26 = smov [#allocation3]   ;;  %s40_s25 = int_to_ptr.hbm [resolvable:$true] %s39_s25 }
   0x6   :  { %s41_s27 = sshll.u32 %s759_s26, 4  ;;  %s760_s28 = smov 128   ;;  %s42_s27 = int_to_ptr.vmem [resolvable:$true] %s41_s27 }
   0x7   :  { %s761_s29 = smov 8  }
   0x8   :  { %47 = dma.hbm_to_vmem [thread:$0]  %s40_s25, 256, %s42_s27, [#allocation4], %s760_s28, %s760_s28, %s761_s29  }
   0x9   :  { %753 = dma.done.wait [#allocation4], 256  }
   0xa   :  { %754 = vsyncadd [#allocation4], 4294967040  ;;  %vm64_vm0 = vcmask 64512   ;;  %v58_v1 = vld [vmem:[%s1025_s4] sm:$0xff]  ;;  %v62_v2 = vld [vmem:[%s1022_s1 + $0x10] sm:$0xff]  ;;  %vm113_vm1 = vcmask 261120  }
   0xb   :  { %v63_v3 = vld [vmem:[%s1022_s1 + $0x18] sm:$0xff]  ;;  %638 = vmatpush.msra.mxu2 %v58_v1  ;;  %639 = vmatpush.msra.mxu3 %v58_v1  ;;  %v61_v4 = vld [vmem:[%s1022_s1 + $0x8] sm:$0xff]  ;;  %v60_v5 = vld [vmem:[%s1022_s1] sm:$0xff]  ;;  %s577_s1 = sshll.u32 %s1032_s11, 4  ;;  %s764_s23 = smov [#allocation7]   ;;  %s578_s1 = int_to_ptr.hbm [resolvable:$true] %s577_s1 }
   0xc   :  { %614 = vmatmul.msk.f32.vlgmr.msra.gmra.mxu2 %vm64_vm0, %v62_v2  ;;  %615 = vmatmul.msk.f32.vlgmr.msra.gmra.mxu3 %vm64_vm0, %v63_v3  ;;  %v159_v6 = vld [vmem:[%s1024_s3] sm:$0xff]  ;;  %v160_v7 = vld [vmem:[%s1024_s3 + $0x8] sm:$0xff]  ;;  %v161_v8 = vld [vmem:[%s1024_s3 + $0x10] sm:$0xff]  ;;  %s575_s24 = sshll.u32 %s764_s23, 4  ;;  %s590_s30 = sshll.u32 %s1033_s12, 4  ;;  %s576_s24 = int_to_ptr.vmem [resolvable:$true] %s575_s24  ;;  %s591_s30 = int_to_ptr.hbm [resolvable:$true] %s590_s30 }
   0xd   :  { %190 = vmatpush.msrb.mxu2 %v58_v1  ;;  %637 = vmatpush.msra.mxu1 %v58_v1  ;;  %v162_v9 = vld [vmem:[%s1024_s3 + $0x18] sm:$0xff]  ;;  %v106_v14 = vld [vmem:[%s1021_s0] sm:$0xff]  ;;  %v107_v16 = vld [vmem:[%s1021_s0 + $0x8] sm:$0xff]  ;;  %s765_s13 = smov [#allocation9]   ;;  %s567_s12 = sshll.u32 %s1031_s10, 4  ;;  %s568_s12 = int_to_ptr.hbm [resolvable:$true] %s567_s12 }
   0xe   :  { %613 = vmatmul.msk.f32.vlgmr.msra.gmra.mxu1 %vm64_vm0, %v61_v4  ;;  %92 = vmatpush.msra.mxu0 %v58_v1  ;;  %v108_v18 = vld [vmem:[%s1021_s0 + $0x10] sm:$0xff]  ;;  %v109_v20 = vld [vmem:[%s1021_s0 + $0x18] sm:$0xff]  ;;  %v204_v22 = vld [vmem:[%s1023_s2] sm:$0xff]  ;;  %s588_s14 = sshll.u32 %s765_s13, 4  ;;  %s589_s14 = int_to_ptr.vmem [resolvable:$true] %s588_s14 }
   0xf   :  { %612 = vmatmul.msk.f32.vlgmr.msra.gmra.mxu0 %vm64_vm0, %v60_v5  ;;  %v205_v23 = vld [vmem:[%s1023_s2 + $0x8] sm:$0xff]  ;;  %v206_v24 = vld [vmem:[%s1023_s2 + $0x10] sm:$0xff]  ;;  %v207_v25 = vld [vmem:[%s1023_s2 + $0x18] sm:$0xff] }
  0x10   :  { %v648_v26 = vld [vmem:[%s1026_s5] ss:$0 sm:$0xff] }
  0x14   :  { %620 = vmatmul.msk.f32.vlgmr.msrb.gmra.mxu2 %vm64_vm0, %v159_v6 }
  0x1c   :  { %621 = vmatmul.msk.f32.gmra.mxu2 %vm64_vm0, %v160_v7 }
  0x24   :  { %622 = vmatmul.msk.f32.gmra.mxu2 %vm64_vm0, %v161_v8 }
  0x2c   :  { %623 = vmatmul.msk.f32.gmra.mxu2 %vm64_vm0, %v162_v9 }
  0x8b   :  { %v97_v12 = vpop.f32.mrf.mxu1 }
  0x8c   :  { %v94_v13 = vpop.f32.mrf.mxu0 }
  0x8f   :  { %v100_v10 = vpop.f32.mrf.mxu2  ;;  %v103_v11 = vpop.f32.mrf.mxu3 }
  0x90   :  { %138 = vmatpush.msrb.mxu1 %v103_v11 }
  0x92   :  { %139 = vmatpush.msrb.mxu1 %v100_v10 }
  0x94   :  { %140 = vmatpush.msrb.mxu1 %v97_v12 }
  0x96   :  { %141 = vmatpush.msrb.mxu1 %v94_v13 }
  0x97   :  { %v192_v15 = vpop.f32.mrf.mxu2  ;;  %616 = vmatmul.msk.f32.vlgmr.msrb.gmra.mxu1 %vm113_vm1, %v106_v14 }
  0x9f   :  { %v195_v17 = vpop.f32.mrf.mxu2  ;;  %617 = vmatmul.msk.f32.gmra.mxu1 %vm113_vm1, %v107_v16 }
  0xa7   :  { %v198_v19 = vpop.f32.mrf.mxu2  ;;  %618 = vmatmul.msk.f32.gmra.mxu1 %vm113_vm1, %v108_v18 }
  0xaf   :  { %v201_v21 = vpop.f32.mrf.mxu2  ;;  %619 = vmatmul.msk.f32.gmra.mxu1 %vm113_vm1, %v109_v20 }
  0xb0   :  { %232 = vmatpush.msrb.mxu3 %v201_v21 }
  0xb2   :  { %233 = vmatpush.msrb.mxu3 %v198_v19 }
  0xb4   :  { %234 = vmatpush.msrb.mxu3 %v195_v17 }
  0xb6   :  { %235 = vmatpush.msrb.mxu3 %v192_v15 }
  0xb7   :  { %624 = vmatmul.msk.f32.vlgmr.msrb.gmra.mxu3 %vm113_vm1, %v204_v22 }
  0xbf   :  { %625 = vmatmul.msk.f32.gmra.mxu3 %vm113_vm1, %v205_v23 }
  0xc7   :  { %626 = vmatmul.msk.f32.gmra.mxu3 %vm113_vm1, %v206_v24 }
  0xcf   :  { %627 = vmatmul.msk.f32.gmra.mxu3 %vm113_vm1, %v207_v25 }
 0x114   :  { %v143_v27 = vpop.f32.mrf.mxu1 }
 0x115   :  { %v144_v28 = vadd.f32 %v648_v26, %v143_v27 }
 0x117   :  { %v155_v29 = vmax.f32 %v144_v28, 0.0 }
 0x119   :  { %253 = vst.msk [vmem:[#allocation7] sm:$0xff] %vm113_vm1, %v155_v29  ;;  %v277_v30 = vmul.f32 %v155_v29, %v155_v29 }
 0x11b   :  { %v281_v31 = vsel %vm113_vm1, %v277_v30, 0.0 }
 0x11c   :  { %v146_v32 = vpop.f32.mrf.mxu1  ;;  %282 = vadd.xlane.f32.xlu0 %v281_v31 }
 0x11d   :  { %v147_v33 = vadd.f32 %v648_v26, %v146_v32 }
 0x11f   :  { %v156_v34 = vmax.f32 %v147_v33, 0.0 }
 0x121   :  { %254 = vst.msk [vmem:[#allocation7 + $0x8] sm:$0xff] %vm113_vm1, %v156_v34  ;;  %v278_v35 = vmul.f32 %v156_v34, %v156_v34 }
 0x123   :  { %v284_v36 = vsel %vm113_vm1, %v278_v35, 0.0 }
 0x124   :  { %v149_v37 = vpop.f32.mrf.mxu1  ;;  %285 = vadd.xlane.f32.xlu0 %v284_v36  ;;  %v361_v36 = vlaneseq }
 0x125   :  { %v150_v38 = vadd.f32 %v648_v26, %v149_v37 }
 0x127   :  { %v157_v39 = vmax.f32 %v150_v38, 0.0 }
 0x129   :  { %255 = vst.msk [vmem:[#allocation7 + $0x10] sm:$0xff] %vm113_vm1, %v157_v39  ;;  %v279_v40 = vmul.f32 %v157_v39, %v157_v39 }
 0x12b   :  { %v287_v41 = vsel %vm113_vm1, %v279_v40, 0.0 }
 0x12c   :  { %v152_v42 = vpop.f32.mrf.mxu1  ;;  %288 = vadd.xlane.f32.xlu2 %v287_v41 }
 0x12d   :  { %v153_v43 = vadd.f32 %v648_v26, %v152_v42  ;;  %v931_v42 = vshrl.u32 %v361_v36, 7 }
 0x12f   :  { %v158_v44 = vmax.f32 %v153_v43, 0.0 }
 0x131   :  { %256 = vst.msk [vmem:[#allocation7 + $0x18] sm:$0xff] %vm113_vm1, %v158_v44  ;;  %v280_v45 = vmul.f32 %v158_v44, %v158_v44 }
 0x132   :  { %583 = dma.vmem_to_hbm [thread:$0]  %s576_s24, 512, %s578_s1, [#allocation8], %s760_s28, %s760_s28, %s761_s29  }
 0x133   :  { %v290_v46 = vsel %vm113_vm1, %v280_v45, 0.0  ;;  %v938_v45 = vadd.s32 8, %v931_v42 }
 0x134   :  { %291 = vadd.xlane.f32.xlu0 %v290_v46 }
 0x13a   :  { %v237_v47 = vpop.f32.mrf.mxu3 }
 0x13b   :  { %v238_v48 = vadd.f32 %v648_v26, %v237_v47 }
 0x13d   :  { %v249_v49 = vmax.f32 %v238_v48, 0.0 }
 0x13f   :  { %257 = vst.msk [vmem:[#allocation9] sm:$0xff] %vm113_vm1, %v249_v49  ;;  %v293_v50 = vmul.f32 %v249_v49, %v249_v49  ;;  %v261_v3 = vmul.f32 %v249_v49, %v155_v29 }
 0x141   :  { %v297_v51 = vsel %vm113_vm1, %v293_v50, 0.0  ;;  %v265_v6 = vsel %vm113_vm1, %v261_v3, 0.0  ;;  %v942_v50 = vand.u32 127, %v361_v36 }
 0x142   :  { %v240_v52 = vpop.f32.mrf.mxu3  ;;  %298 = vadd.xlane.f32.xlu1 %v297_v51 }
 0x143   :  { %v241_v53 = vadd.f32 %v648_v26, %v240_v52  ;;  %vm369_vm11 = vcmp.eq.s32.totalorder %v938_v45, %v942_v50  ;;  %vm368_vm12 = vcmp.eq.s32.totalorder %v931_v42, %v942_v50 }
 0x145   :  { %v250_v54 = vmax.f32 %v241_v53, 0.0 }
 0x147   :  { %258 = vst.msk [vmem:[#allocation9 + $0x8] sm:$0xff] %vm113_vm1, %v250_v54  ;;  %v294_v55 = vmul.f32 %v250_v54, %v250_v54  ;;  %v262_v56 = vmul.f32 %v250_v54, %v156_v34 }
 0x149   :  { %v300_v57 = vsel %vm113_vm1, %v294_v55, 0.0  ;;  %v268_v58 = vsel %vm113_vm1, %v262_v56, 0.0  ;;  %v364_v55 = vadd.s32 16, %v931_v42 }
 0x14a   :  { %v243_v59 = vpop.f32.mrf.mxu3  ;;  %301 = vadd.xlane.f32.xlu1 %v300_v57  ;;  %269 = vadd.xlane.f32.xlu0 %v268_v58 }
 0x14b   :  { %v244_v60 = vadd.f32 %v648_v26, %v243_v59  ;;  %vm370_vm13 = vcmp.eq.s32.totalorder %v364_v55, %v942_v50 }
 0x14d   :  { %v251_v61 = vmax.f32 %v244_v60, 0.0 }
 0x14f   :  { %259 = vst.msk [vmem:[#allocation9 + $0x10] sm:$0xff] %vm113_vm1, %v251_v61  ;;  %v295_v62 = vmul.f32 %v251_v61, %v251_v61  ;;  %v263_v7 = vmul.f32 %v251_v61, %v157_v39 }
 0x151   :  { %v303_v63 = vsel %vm113_vm1, %v295_v62, 0.0  ;;  %v271_v9 = vsel %vm113_vm1, %v263_v7, 0.0 }
 0x152   :  { %v246_v0 = vpop.f32.mrf.mxu3  ;;  %304 = vadd.xlane.f32.xlu2 %v303_v63 }
 0x153   :  { %v247_v1 = vadd.f32 %v648_v26, %v246_v0 }
 0x155   :  { %v252_v2 = vmax.f32 %v247_v1, 0.0 }
 0x157   :  { %260 = vst.msk [vmem:[#allocation9 + $0x18] sm:$0xff] %vm113_vm1, %v252_v2  ;;  %v296_v4 = vmul.f32 %v252_v2, %v252_v2  ;;  %v264_v8 = vmul.f32 %v252_v2, %v158_v44  ;;  %v365_v2 = vadd.s32 24, %v931_v42 }
 0x158   :  { %596 = dma.vmem_to_hbm [thread:$0]  %s589_s14, 512, %s591_s30, [#allocation8], %s760_s28, %s760_s28, %s761_s29  }
 0x159   :  { %v306_v5 = vsel %vm113_vm1, %v296_v4, 0.0  ;;  %v274_v10 = vsel %vm113_vm1, %v264_v8, 0.0 }
 0x15a   :  { %307 = vadd.xlane.f32.xlu1 %v306_v5  ;;  %266 = vadd.xlane.f32.xlu2 %v265_v6 }
 0x162   :  { %272 = vadd.xlane.f32.xlu1 %v271_v9  ;;  %275 = vadd.xlane.f32.xlu2 %v274_v10 }
 0x18f   :  { %v283_v11 = vpop.xlane.xlu0 %282 }
 0x197   :  { %v286_v16 = vpop.xlane.xlu0 %285 }
 0x19f   :  { %v289_v15 = vpop.xlane.xlu2 %288 }
 0x1a7   :  { %v292_v29 = vpop.xlane.xlu0 %291 }
 0x1b5   :  { %v299_v12 = vpop.xlane.xlu1 %298 }
 0x1b6   :  { %v309_v13 = vmul.f32 %v299_v12, %v283_v11 }
 0x1b8   :  { %v313_v14 = vmax.f32 %v309_v13, 1e-16 }
 0x1ba   :  { %649 = vrsqrt.f32 %v313_v14  ;;  %vm323_vm7 = vweird.f32 %v313_v14 }
 0x1bd   :  { %v302_v17 = vpop.xlane.xlu1 %301  ;;  %v270_v51 = vpop.xlane.xlu0 %269 }
 0x1be   :  { %v310_v18 = vmul.f32 %v302_v17, %v286_v16 }
 0x1c0   :  { %v314_v19 = vmax.f32 %v310_v18, 1e-16  ;;  %v650_v20 = vpop.eup %649 }
 0x1c1   :  { %v318_v23 = vmul.f32 %v650_v20, %v313_v14  ;;  %vm324_vm5 = vweird.f32 %v650_v20 }
 0x1c2   :  { %651 = vrsqrt.f32 %v314_v19  ;;  %vm333_vm3 = vweird.f32 %v314_v19  ;;  %vm325_vm8 = vmor %vm323_vm7, %vm324_vm5  ;;  %vm403_vm5 = vcmp.lt.s32.totalorder %v942_v50, %v364_v55 }
 0x1c3   :  { %v319_v27 = vmul.f32 %v650_v20, %v318_v23  ;;  %v762_v23 = vmov 0  }
 0x1c5   :  { %v305_v21 = vpop.xlane.xlu2 %304  ;;  %v320_v33 = vmul.f32 0.5, %v319_v27 }
 0x1c6   :  { %v311_v22 = vmul.f32 %v305_v21, %v289_v15 }
 0x1c7   :  { %v321_v41 = vsub.f32 1.5, %v320_v33 }
 0x1c8   :  { %v652_v24 = vpop.eup %651  ;;  %v315_v25 = vmax.f32 %v311_v22, 1e-16 }
 0x1c9   :  { %v328_v26 = vmul.f32 %v652_v24, %v314_v19  ;;  %vm334_vm2 = vweird.f32 %v652_v24  ;;  %v322_v47 = vmul.f32 %v650_v20, %v321_v41 }
 0x1ca   :  { %653 = vrsqrt.f32 %v315_v25  ;;  %vm933_vm4 = vmor %vm333_vm3, %vm334_vm2  ;;  %vm343_vm9 = vweird.f32 %v315_v25  ;;  %vm371_vm2 = vcmp.eq.s32.totalorder %v365_v2, %v942_v50  ;;  %vm402_vm3 = vcmp.lt.s32.totalorder %v942_v50, %v938_v45 }
 0x1cb   :  { %v329_v28 = vmul.f32 %v652_v24, %v328_v26  ;;  %v326_v58 = vsel %vm325_vm8, %v650_v20, %v322_v47 }
 0x1cd   :  { %v330_v30 = vmul.f32 0.5, %v329_v28  ;;  %v308_v31 = vpop.xlane.xlu1 %307  ;;  %v267_v53 = vpop.xlane.xlu2 %266 }
 0x1ce   :  { %v312_v32 = vmul.f32 %v308_v31, %v292_v29  ;;  %v949_v61 = vmul.f32 %v326_v58, %v267_v53  ;;  %v482_v58 = vld [vmem:[#allocation3 + $0x8] sm:$0x7f] }
 0x1cf   :  { %v331_v34 = vsub.f32 1.5, %v330_v30 }
 0x1d0   :  { %v654_v35 = vpop.eup %653  ;;  %v316_v37 = vmax.f32 %v312_v32, 1e-16  ;;  %v372_v3 = vsel %vm368_vm12, %v949_v61, 0.0 }
 0x1d1   :  { %v338_v38 = vmul.f32 %v654_v35, %v315_v25  ;;  %v332_v39 = vmul.f32 %v652_v24, %v331_v34  ;;  %vm344_vm6 = vweird.f32 %v654_v35  ;;  %v376_v7 = vsel %vm113_vm1, %v372_v3, 0.0 }
 0x1d2   :  { %655 = vrsqrt.f32 %v316_v37  ;;  %vm345_vm10 = vmor %vm343_vm9, %vm344_vm6  ;;  %vm353_vm15 = vweird.f32 %v316_v37 }
 0x1d3   :  { %v339_v40 = vmul.f32 %v654_v35, %v338_v38  ;;  %v336_v46 = vsel %vm933_vm4, %v652_v24, %v332_v39  ;;  %vm401_vm4 = vcmp.lt.s32.totalorder %v942_v50, %v931_v42 }
 0x1d4   :  { %v945_v56 = vmul.f32 %v336_v46, %v270_v51 }
 0x1d5   :  { %v340_v43 = vmul.f32 0.5, %v339_v40  ;;  %v273_v60 = vpop.xlane.xlu1 %272  ;;  %v276_v10 = vpop.xlane.xlu2 %275 }
 0x1d6   :  { %v373_v0 = vsel %vm369_vm11, %v945_v56, 0.0 }
 0x1d7   :  { %v341_v48 = vsub.f32 1.5, %v340_v43  ;;  %v377_v5 = vsel %vm113_vm1, %v373_v0, 0.0 }
 0x1d8   :  { %v656_v49 = vpop.eup %655  ;;  %v378_v11 = vadd.f32 %v377_v5, %v376_v7 }
 0x1d9   :  { %v348_v52 = vmul.f32 %v656_v49, %v316_v37  ;;  %v342_v54 = vmul.f32 %v654_v35, %v341_v48  ;;  %vm354_vm14 = vweird.f32 %v656_v49 }
 0x1da   :  { %vm355_vm0 = vmor %vm353_vm15, %vm354_vm14 }
 0x1db   :  { %v349_v57 = vmul.f32 %v656_v49, %v348_v52  ;;  %v346_v59 = vsel %vm345_vm10, %v654_v35, %v342_v54 }
 0x1dc   :  { %v951_v62 = vmul.f32 %v346_v59, %v273_v60  ;;  %v481_v59 = vld [vmem:[#allocation3] sm:$0xff] }
 0x1dd   :  { %v350_v63 = vmul.f32 0.5, %v349_v57 }
 0x1de   :  { %v374_v4 = vsel %vm370_vm13, %v951_v62, 0.0 }
 0x1df   :  { %v351_v1 = vsub.f32 1.5, %v350_v63  ;;  %v379_v8 = vsel %vm113_vm1, %v374_v4, 0.0 }
 0x1e0   :  { %v380_v13 = vadd.f32 %v379_v8, %v378_v11  ;;  %v763_v8 = vmov 0.0  }
 0x1e1   :  { %v352_v6 = vmul.f32 %v656_v49, %v351_v1 }
 0x1e3   :  { %v356_v9 = vsel %vm355_vm0, %v656_v49, %v352_v6  ;;  %vm404_vm0 = vcmp.lt.s32.totalorder %v942_v50, %v365_v2 }
 0x1e4   :  { %v964_v12 = vmul.f32 %v356_v9, %v276_v10 }
 0x1e6   :  { %v375_v14 = vsel %vm371_vm2, %v964_v12, 0.0 }
 0x1e7   :  { %v381_v15 = vsel %vm113_vm1, %v375_v14, 0.0 }
 0x1e8   :  { %v382_v16 = vadd.f32 %v381_v15, %v380_v13 }
 0x1ea   :  { %v383_v17 = vrot.slane %v382_v16, 4 }
 0x1ec   :  { %v384_v18 = vadd.f32 %v383_v17, %v382_v16 }
 0x1ee   :  { %v385_v19 = vrot.slane %v384_v18, 2 }
 0x1f0   :  { %v386_v20 = vadd.f32 %v385_v19, %v384_v18 }
 0x1f2   :  { %v387_v21 = vrot.slane %v386_v20, 1 }
 0x1f4   :  { %v388_v22 = vadd.f32 %v387_v21, %v386_v20 }
 0x1f6   :  { %vm390_vm6 = vcmp.lt.f32.partialorder %v388_v22, %v945_v56  ;;  %vm398_vm7 = vcmp.eq.f32.partialorder %v388_v22, %v945_v56  ;;  %vm389_vm8 = vcmp.lt.f32.partialorder %v388_v22, %v949_v61  ;;  %vm397_vm9 = vcmp.eq.f32.partialorder %v388_v22, %v949_v61 }
 0x1f7   :  { %v394_v24 = vsel %vm390_vm6, 1, %v762_v23  ;;  %vm406_vm10 = vmand %vm398_vm7, %vm402_vm3  ;;  %v393_v25 = vsel %vm389_vm8, 1, %v762_v23  ;;  %vm391_vm11 = vcmp.lt.f32.partialorder %v388_v22, %v951_v62  ;;  %vm399_vm12 = vcmp.eq.f32.partialorder %v388_v22, %v951_v62 }
 0x1f8   :  { %v410_v26 = vsel %vm406_vm10, 1, %v762_v23  ;;  %vm405_vm13 = vmand %vm397_vm9, %vm401_vm4  ;;  %v395_v27 = vsel %vm391_vm11, 1, %v762_v23  ;;  %vm400_vm15 = vcmp.eq.f32.partialorder %v388_v22, %v964_v12  ;;  %vm392_vm2 = vcmp.lt.f32.partialorder %v388_v22, %v964_v12 }
 0x1f9   :  { %v414_v28 = vadd.s32 %v410_v26, %v394_v24  ;;  %v409_v29 = vsel %vm405_vm13, 1, %v762_v23  ;;  %vm407_vm14 = vmand %vm399_vm12, %vm403_vm5  ;;  %v396_v42 = vsel %vm392_vm2, 1, %v762_v23  ;;  %vm496_vm4 = vcmask 1046528  }
 0x1fa   :  { %v413_v30 = vadd.s32 %v409_v29, %v393_v25  ;;  %v411_v31 = vsel %vm407_vm14, 1, %v762_v23  ;;  %vm408_vm3 = vmand %vm400_vm15, %vm404_vm0  ;;  %632 = vmatpush.msk.msrb.mxu0 %vm496_vm4, %v482_v58  ;;  %vm534_vm9 = vcmask 130048   ;;  %vm552_vm10 = vcmask 122880  }
 0x1fb   :  { %v430_v32 = vsel %vm113_vm1, %v414_v28, 0  ;;  %v415_v33 = vadd.s32 %v411_v31, %v395_v27  ;;  %v412_v43 = vsel %vm408_vm3, 1, %v762_v23  ;;  %vm558_vm11 = vcmask 0  }
 0x1fc   :  { %v432_v34 = vshrl.u32 %v430_v32, 16  ;;  %v417_v35 = vsel %vm113_vm1, %v413_v30, 0  ;;  %v431_v45 = vand.u32 65535, %v430_v32  ;;  %v416_v47 = vadd.s32 %v412_v43, %v396_v42  ;;  %515 = vmatpush.msrb.mxu0 %v481_v59 }
 0x1fd   :  { %v419_v36 = vshrl.u32 %v417_v35, 16  ;;  %v418_v37 = vand.u32 65535, %v417_v35  ;;  %v443_v41 = vsel %vm113_vm1, %v415_v33, 0 }
 0x1fe   :  { %v434_v38 = vcvt.s32.f32 %v432_v34  ;;  %v444_v44 = vand.u32 65535, %v443_v41  ;;  %v445_v46 = vshrl.u32 %v443_v41, 16  ;;  %v433_v49 = vcvt.s32.f32 %v431_v45 }
 0x1ff   :  { %v421_v39 = vcvt.s32.f32 %v419_v36  ;;  %v420_v40 = vcvt.s32.f32 %v418_v37  ;;  %v456_v52 = vsel %vm113_vm1, %v416_v47, 0  ;;  %vm483_vm1 = vcmask 121856  }
 0x200   :  { %437 = vadd.xlane.f32.xlu2 %v434_v38  ;;  %v446_v48 = vcvt.s32.f32 %v444_v44  ;;  %v447_v51 = vcvt.s32.f32 %v445_v46  ;;  %v458_v53 = vshrl.u32 %v456_v52, 16  ;;  %v457_v54 = vand.u32 65535, %v456_v52  ;;  %v550_v46 = vld [vmem:[%s1029_s8] sm:$0x1] }
 0x201   :  { %424 = vadd.xlane.f32.xlu0 %v421_v39  ;;  %422 = vadd.xlane.f32.xlu1 %v420_v40 }
 0x202   :  { %v460_v55 = vcvt.s32.f32 %v458_v53  ;;  %v459_v57 = vcvt.s32.f32 %v457_v54 }
 0x208   :  { %448 = vadd.xlane.f32.xlu2 %v446_v48 }
 0x209   :  { %435 = vadd.xlane.f32.xlu0 %v433_v49  ;;  %450 = vadd.xlane.f32.xlu1 %v447_v51  ;;  %v556_v51 = vld [vmem:[#allocation2] sm:$0x1] }
 0x211   :  { %463 = vadd.xlane.f32.xlu0 %v460_v55  ;;  %461 = vadd.xlane.f32.xlu1 %v459_v57 }
 0x273   :  { %v438_v1 = vpop.xlane.xlu2 %437 }
 0x274   :  { %v425_v60 = vpop.xlane.xlu0 %424  ;;  %v423_v63 = vpop.xlane.xlu1 %422  ;;  %v440_v4 = vcvt.f32.s32 %v438_v1 }
 0x275   :  { %v427_v0 = vcvt.f32.s32 %v425_v60  ;;  %v426_v3 = vcvt.f32.s32 %v423_v63 }
 0x276   :  { %v441_v10 = vshll.u32 %v440_v4, 16 }
 0x277   :  { %v428_v2 = vshll.u32 %v427_v0, 16 }
 0x279   :  { %v429_v5 = vadd.s32 %v428_v2, %v426_v3 }
 0x27b   :  { %vm469_vm5 = vcmp.eq.s32.totalorder %v429_v5, %v942_v50  ;;  %v449_v15 = vpop.xlane.xlu2 %448 }
 0x27c   :  { %v436_v6 = vpop.xlane.xlu0 %435  ;;  %v451_v7 = vpop.xlane.xlu1 %450  ;;  %v628_v9 = vsel %vm469_vm5, 1.0, %v763_v8  ;;  %v452_v17 = vcvt.f32.s32 %v449_v15 }
 0x27d   :  { %v439_v11 = vcvt.f32.s32 %v436_v6  ;;  %v453_v13 = vcvt.f32.s32 %v451_v7  ;;  %633 = vmatmul.msk.f32.vlgmr.msrb.gmra.mxu0 %vm483_vm1, %v628_v9 }
 0x27f   :  { %v442_v14 = vadd.s32 %v441_v10, %v439_v11  ;;  %v454_v16 = vshll.u32 %v453_v13, 16 }
 0x281   :  { %vm470_vm6 = vcmp.eq.s32.totalorder %v442_v14, %v942_v50  ;;  %v455_v20 = vadd.s32 %v454_v16, %v452_v17 }
 0x282   :  { %v629_v19 = vsel %vm470_vm6, 1.0, %v763_v8 }
 0x283   :  { %vm471_vm7 = vcmp.eq.s32.totalorder %v455_v20, %v942_v50 }
 0x284   :  { %v464_v18 = vpop.xlane.xlu0 %463  ;;  %v462_v22 = vpop.xlane.xlu1 %461  ;;  %v630_v25 = vsel %vm471_vm7, 1.0, %v763_v8 }
 0x285   :  { %v466_v21 = vcvt.f32.s32 %v464_v18  ;;  %634 = vmatmul.msk.f32.gmra.mxu0 %vm483_vm1, %v629_v19  ;;  %v465_v24 = vcvt.f32.s32 %v462_v22 }
 0x287   :  { %v467_v23 = vshll.u32 %v466_v21, 16 }
 0x289   :  { %v468_v26 = vadd.s32 %v467_v23, %v465_v24 }
 0x28b   :  { %vm472_vm8 = vcmp.eq.s32.totalorder %v468_v26, %v942_v50 }
 0x28c   :  { %v631_v27 = vsel %vm472_vm8, 1.0, %v763_v8 }
 0x28d   :  { %635 = vmatmul.msk.f32.gmra.mxu0 %vm483_vm1, %v630_v25 }
 0x295   :  { %636 = vmatmul.msk.f32.gmra.mxu0 %vm483_vm1, %v631_v27 }
 0x2fa   :  { %v517_v28 = vpop.f32.mrf.mxu0 }
 0x2fb   :  { %v530_v32 = vmul.f32 %v517_v28, %v949_v61  ;;  %v529_v61 = vld [vmem:[%s1028_s7] sm:$0x1]  ;;  %s766_s7 = smov [#allocation6]  }
 0x2fc   :  { %s565_s8 = sshll.u32 %s766_s7, 4  ;;  %s566_s8 = int_to_ptr.vmem [resolvable:$true] %s565_s8 }
 0x2fd   :  { %v535_v35 = vsel %vm534_vm9, %v530_v32, 0.0 }
 0x302   :  { %v520_v29 = vpop.f32.mrf.mxu0 }
 0x303   :  { %v531_v31 = vmul.f32 %v520_v29, %v945_v56 }
 0x305   :  { %v536_v34 = vsel %vm534_vm9, %v531_v31, 0.0 }
 0x306   :  { %v537_v37 = vadd.f32 %v536_v34, %v535_v35 }
 0x30a   :  { %v523_v30 = vpop.f32.mrf.mxu0 }
 0x30b   :  { %v532_v33 = vmul.f32 %v523_v30, %v951_v62 }
 0x30d   :  { %v538_v36 = vsel %vm534_vm9, %v532_v33, 0.0 }
 0x30e   :  { %v539_v39 = vadd.f32 %v538_v36, %v537_v37 }
 0x312   :  { %v526_v38 = vpop.f32.mrf.mxu0 }
 0x313   :  { %v533_v50 = vmul.f32 %v526_v38, %v964_v12 }
 0x315   :  { %v540_v40 = vsel %vm534_vm9, %v533_v50, 0.0 }
 0x316   :  { %v541_v41 = vadd.f32 %v540_v40, %v539_v39 }
 0x318   :  { %v542_v42 = vrot.slane %v541_v41, 4 }
 0x31a   :  { %v543_v43 = vadd.f32 %v542_v42, %v541_v41 }
 0x31c   :  { %v544_v44 = vrot.slane %v543_v43, 2 }
 0x31e   :  { %v545_v45 = vadd.f32 %v544_v44, %v543_v43 }
 0x320   :  { %v546_v56 = vrot.slane %v545_v45, 1 }
 0x322   :  { %v547_v62 = vadd.f32 %v546_v56, %v545_v45 }
 0x324   :  { %v548_v12 = vadd.f32 %v547_v62, %v529_v61 }
 0x326   :  { %v549_v47 = vmax.f32 %v548_v12, 0.0 }
 0x328   :  { %v551_v48 = vmul.f32 %v550_v46, %v549_v47 }
 0x32a   :  { %v553_v49 = vsel %vm552_vm10, %v551_v48, 0.0 }
 0x32b   :  { %554 = vadd.xlane.f32.xlu2 %v553_v49 }
 0x39e   :  { %v555_v52 = vpop.xlane.xlu2 %554 }
 0x39f   :  { %v557_v53 = vadd.f32 %v556_v51, %v555_v52 }
 0x3a1   :  { %559 = vst.msk [vmem:[#allocation6] sm:$0x1] %vm558_vm11, %v557_v53 }
 0x3a2   :  { %570 = dma.vmem_to_hbm [thread:$0]  %s566_s8, 16, %s568_s12, [#allocation5]  }
 0x3a3   :  { %755 = dma.done.wait [#allocation5], 16  }
 0x3a4   :  { %756 = vsyncadd [#allocation5], 4294967280 }
 0x3a5   :  { %757 = dma.done.wait [#allocation8], 1024  }
 0x3a6   :  { %758 = vsyncadd [#allocation8], 4294966272 }
 0x3a7   :  { %609 = vsyncpa [#allocation4], 1 }
 0x3a8   :  { %610 = vsyncpa [#allocation5], 1 }
 0x3a9   :  { %611 = vsyncpa [#allocation8], 1 }

</bundles_post_ra>
